<compile_context>
chip_gen: v5e
topology: v5e:2x2
jax: 0.10.0
libtpu: 0.0.40
codegen_flags: <defaults>
</compile_context>

<pallas_src>
import jax
import jax.numpy as jnp
from jax.experimental import pallas as pl
from jax.experimental.pallas import tpu as pltpu


# ------------------------- fused Pallas kernel -------------------------

def _make_fused_rmblock_kernel(H, W, Ho, Wo, stride, identity):
    """Builds the fused conv1+bn1+relu -> dw3x3+bn2+relu -> conv3+bn3+res+relu
    kernel, specialised (at trace time) on stride and the identity-residual
    fast path."""

    def _subsample(a, s):
        # Keep every s-th row / column (rows/cols 0, s, 2s, ...) of (R, C, K).
        # Implemented with contiguous slices + reshapes only (no strided loads)
        # for robust Mosaic lowering; the lane (last) dim is never touched.
        if s == 1:
            return a
        R, C, K = a.shape
        a = a.reshape(R // s, s, C, K)[:, 0]
        return a.reshape(R // s, C // s, s, K)[:, :, 0, :]

    def kernel(x_ref, w1_ref, b1_ref, w2_ref, b2_ref, w3_ref, b3_ref, *rest):
        if identity:
            o_ref, mid_ref = rest
        else:
            wd_ref, bd_ref, o_ref, mid_ref = rest

        M = mid_ref.shape[-1]          # mid_planes
        Cin = x_ref.shape[-1]          # in_planes

        # ---- conv1 (1x1, bn1 scale folded into w1) + bias + ReLU ----------
        x_img = x_ref[0]                                   # (H, W, Cin)
        x2d = x_img.reshape(H * W, Cin)
        h1 = jnp.dot(x2d, w1_ref[...], preferred_element_type=jnp.float32)
        h1 = jnp.maximum(h1 + b1_ref[...], 0.0)            # (H*W, M)

        # ---- zero halo in VMEM scratch (padding=1, no HBM pad round trip) --
        mid_ref[...] = jnp.zeros_like(mid_ref)
        mid_ref[1:1 + H, 1:1 + W, :] = h1.reshape(H, W, M)

        # ---- conv2: 3x3 depthwise, stride s (computed directly) + ReLU -----
        acc = jnp.zeros((Ho, Wo, M), jnp.float32)
        for kh in range(3):
            for kw in range(3):
                blk = mid_ref[kh:kh + H, kw:kw + W, :]      # (H, W, M)
                tap = _subsample(blk, stride)               # (Ho, Wo, M)
                k = kh * 3 + kw
                acc = acc + tap * w2_ref[k:k + 1, :]        # (1, M) broadcast
        h2 = jnp.maximum(acc + b2_ref[...], 0.0).reshape(Ho * Wo, M)

        # ---- conv3 (1x1, bn3 folded) + residual/downsample + ReLU ----------
        y = jnp.dot(h2, w3_ref[...], preferred_element_type=jnp.float32)
        y = y + b3_ref[...]
        if identity:
            # stride == 1 and Cin == Cout: plain residual add, no matmul.
            res = x_img.reshape(Ho * Wo, Cin)
        else:
            xd = _subsample(x_img, stride).reshape(Ho * Wo, Cin)
            res = jnp.dot(xd, wd_ref[...], preferred_element_type=jnp.float32)
            res = res + bd_ref[...]
        o_ref[0] = jnp.maximum(y + res, 0.0)                # (Ho*Wo, Cout)

    return kernel


# ------------------------- params / BN folding -------------------------

def _bn_fold(gamma, beta, mean, var, eps=1e-5):
    scale = gamma / jnp.sqrt(var + eps)
    return scale, beta - mean * scale


def init_rmblock_params(key, in_planes, out_planes, expand_ratio=2):
    mid = out_planes * expand_ratio - out_planes
    ks = jax.random.split(key, 8)

    def bn_params(k, c):
        k1, k2, k3, k4 = jax.random.split(k, 4)
        return dict(gamma=1.0 + 0.1 * jax.random.normal(k1, (c,), jnp.float32),
                    beta=0.1 * jax.random.normal(k2, (c,), jnp.float32),
                    mean=0.1 * jax.random.normal(k3, (c,), jnp.float32),
                    var=jax.random.uniform(k4, (c,), jnp.float32, 0.5, 1.5))

    return dict(
        w1=0.2 * jax.random.normal(ks[0], (in_planes, mid), jnp.float32),
        bn1=bn_params(ks[1], mid),
        w2=0.2 * jax.random.normal(ks[2], (3, 3, mid), jnp.float32),
        bn2=bn_params(ks[3], mid),
        w3=0.2 * jax.random.normal(ks[4], (mid, out_planes), jnp.float32),
        bn3=bn_params(ks[5], out_planes),
        wd=0.2 * jax.random.normal(ks[6], (in_planes, out_planes), jnp.float32),
        bnd=bn_params(ks[7], out_planes),
    )


# ------------------------- forward (pallas_call wrapper) -------------------------

def rmblock_forward_pallas(x, params, stride, in_planes, out_planes, cpg=1):
    assert cpg == 1, "only cpg=1 (depthwise conv2) is implemented"
    n, h, w, _ = x.shape
    mid = params['w1'].shape[1]
    # TODO(synk): ragged strided shapes (stride not dividing H/W) unsupported.
    assert stride == 1 or (h % stride == 0 and w % stride == 0)
    ho, wo = h // stride, w // stride

    # Fold BN scale into the conv weights; kernels only add the bias.
    s1, b1 = _bn_fold(**params['bn1'])
    s2, b2 = _bn_fold(**params['bn2'])
    s3, b3 = _bn_fold(**params['bn3'])
    w1f = params['w1'] * s1[None, :]
    w2f = params['w2'].reshape(9, mid) * s2[None, :]
    w3f = params['w3'] * s3[None, :]

    identity = (stride == 1 and in_planes == out_planes)

    args = [x, w1f, b1[None, :], w2f, b2[None, :], w3f, b3[None, :]]
    in_specs = [
        pl.BlockSpec((1, h, w, in_planes), lambda b: (b, 0, 0, 0)),
        pl.BlockSpec((in_planes, mid), lambda b: (0, 0)),
        pl.BlockSpec((1, mid), lambda b: (0, 0)),
        pl.BlockSpec((9, mid), lambda b: (0, 0)),
        pl.BlockSpec((1, mid), lambda b: (0, 0)),
        pl.BlockSpec((mid, out_planes), lambda b: (0, 0)),
        pl.BlockSpec((1, out_planes), lambda b: (0, 0)),
    ]
    if not identity:
        sd, bd = _bn_fold(**params['bnd'])
        wdf = params['wd'] * sd[None, :]
        args += [wdf, bd[None, :]]
        in_specs += [pl.BlockSpec((in_planes, out_planes), lambda b: (0, 0)),
                     pl.BlockSpec((1, out_planes), lambda b: (0, 0))]

    kernel = _make_fused_rmblock_kernel(h, w, ho, wo, stride, identity)

    # Explicit VMEM budget (v5e default scoped is only 16 MiB; v7x physical is
    # 64 MiB) — estimate double-buffered blocks + scratch + temporaries.
    blk_bytes = 4 * (h * w * in_planes + ho * wo * out_planes
                     + in_planes * mid + 9 * mid + mid * out_planes
                     + in_planes * out_planes + 2 * mid + 2 * out_planes)
    scratch_bytes = 4 * (h + 2) * (w + 2) * mid
    tmp_bytes = 4 * (3 * h * w * mid + 3 * ho * wo * mid
                     + 3 * ho * wo * out_planes)
    vmem_limit = int(min(max(2 * blk_bytes + scratch_bytes + tmp_bytes
                             + (8 << 20), 32 << 20), 56 << 20))

    out = pl.pallas_call(
        kernel,
        out_shape=jax.ShapeDtypeStruct((n, ho * wo, out_planes), jnp.float32),
        grid=(n,),
        in_specs=in_specs,
        out_specs=pl.BlockSpec((1, ho * wo, out_planes), lambda b: (b, 0, 0)),
        scratch_shapes=[pltpu.VMEM((h + 2, w + 2, mid), jnp.float32)],
        compiler_params=pltpu.CompilerParams(
            dimension_semantics=("parallel",),       # v7x: 2 TCs split the batch
            vmem_limit_bytes=vmem_limit),
    )(*args)
    return out.reshape(n, ho, wo, out_planes)


# ------------------------- pure-JAX reference -------------------------

def rmblock_forward_ref(x, params, stride, in_planes, out_planes):
    eps = 1e-5
    dn = ('NHWC', 'HWIO', 'NHWC')
    mid = params['w1'].shape[1]

    def bn(y, p):
        return (y - p['mean']) / jnp.sqrt(p['var'] + eps) * p['gamma'] + p['beta']

    out = jax.lax.conv_general_dilated(x, params['w1'][None, None], (1, 1),
                                       'VALID', dimension_numbers=dn)
    out = jax.nn.relu(bn(out, params['bn1']))
    out = jax.lax.conv_general_dilated(out, params['w2'][:, :, None, :],
                                       (stride, stride), ((1, 1), (1, 1)),
                                       dimension_numbers=dn,
                                       feature_group_count=mid)
    out = jax.nn.relu(bn(out, params['bn2']))
    out = jax.lax.conv_general_dilated(out, params['w3'][None, None], (1, 1),
                                       'VALID', dimension_numbers=dn)
    out = bn(out, params['bn3'])
    if stride == 1 and in_planes == out_planes:
        sc = x
    else:
        sc = jax.lax.conv_general_dilated(x, params['wd'][None, None],
                                          (stride, stride), 'VALID',
                                          dimension_numbers=dn)
        sc = bn(sc, params['bnd'])
    return jax.nn.relu(out + sc)


# ------------------------- main -------------------------

if __name__ == "__main__":
    key = jax.random.PRNGKey(0)
    N, H, W = 2, 8, 8
    expand_ratio = 2

    # (in_planes, out_planes, stride): identity residual / 1x1 downsample /
    # strided depthwise + strided downsample.
    configs = [(16, 16, 1), (8, 16, 1), (8, 16, 2)]

    for cin, cout, stride in configs:
        key, k_x, k_p = jax.random.split(key, 3)
        x = jax.random.normal(k_x, (N, H, W, cin), jnp.float32)   # NHWC
        params = init_rmblock_params(k_p, cin, cout, expand_ratio)

        out = rmblock_forward_pallas(x, params, stride, cin, cout)
        out = jax.block_until_ready(out)

        ref = rmblock_forward_ref(x, params, stride, cin, cout)
        err = float(jnp.max(jnp.abs(out - ref)))
        assert err < 1e-3, (
            f"config (in={cin}, out={cout}, stride={stride}): "
            f"max abs err = {err}")

    print("KERNEL_OK")
</pallas_src>

<mosaic_0001>
module attributes {stable_mosaic.version = 11 : i64} {
  func.func @kernel(%arg0: i32, %arg1: memref<1x8x8x16xf32, #tpu.memory_space<vmem>>, %arg2: memref<16x16xf32, #tpu.memory_space<vmem>>, %arg3: memref<1x16xf32, #tpu.memory_space<vmem>>, %arg4: memref<9x16xf32, #tpu.memory_space<vmem>>, %arg5: memref<1x16xf32, #tpu.memory_space<vmem>>, %arg6: memref<16x16xf32, #tpu.memory_space<vmem>>, %arg7: memref<1x16xf32, #tpu.memory_space<vmem>>, %arg8: memref<1x64x16xf32, #tpu.memory_space<vmem>>, %arg9: memref<10x10x16xf32, #tpu.memory_space<vmem>>) attributes {dimension_semantics = [#tpu.dimension_semantics<parallel>], iteration_bounds = array<i64: 2>, scalar_prefetch = 0 : i64, scratch_operands = 1 : i64, tpu.core_type = #tpu.core_type<tc>, window_params = [{transform_indices = @transform_0, window_bounds = array<i64: 1, 8, 8, 16>}, {pipeline_mode = #tpu.pipeline_mode<synchronous>, transform_indices = @transform_1, window_bounds = array<i64: 16, 16>}, {pipeline_mode = #tpu.pipeline_mode<synchronous>, transform_indices = @transform_2, window_bounds = array<i64: 1, 16>}, {pipeline_mode = #tpu.pipeline_mode<synchronous>, transform_indices = @transform_3, window_bounds = array<i64: 9, 16>}, {pipeline_mode = #tpu.pipeline_mode<synchronous>, transform_indices = @transform_4, window_bounds = array<i64: 1, 16>}, {pipeline_mode = #tpu.pipeline_mode<synchronous>, transform_indices = @transform_5, window_bounds = array<i64: 16, 16>}, {pipeline_mode = #tpu.pipeline_mode<synchronous>, transform_indices = @transform_6, window_bounds = array<i64: 1, 16>}, {transform_indices = @transform_7, window_bounds = array<i64: 1, 64, 16>}]} {
    %c0 = arith.constant 0 : index
    %c0_0 = arith.constant 0 : index
    %c0_1 = arith.constant 0 : index
    %c0_2 = arith.constant 0 : index
    %0 = vector.load %arg1[%c0, %c0_0, %c0_1, %c0_2] : memref<1x8x8x16xf32, #tpu.memory_space<vmem>>, vector<1x8x8x16xf32>
    %1 = vector.shape_cast %0 : vector<1x8x8x16xf32> to vector<8x8x16xf32>
    %2 = vector.shape_cast %1 : vector<8x8x16xf32> to vector<64x16xf32>
    %c0_3 = arith.constant 0 : index
    %c0_4 = arith.constant 0 : index
    %3 = vector.load %arg2[%c0_3, %c0_4] : memref<16x16xf32, #tpu.memory_space<vmem>>, vector<16x16xf32>
    %cst = arith.constant dense<0.000000e+00> : vector<64x16xf32>
    %4 = tpu.matmul %2, %3, %cst {dimension_numbers = #tpu.dot_dimension_numbers<[1], [0], [0], [1], [0, 0, 1, 1], [], []>} : vector<64x16xf32>, vector<16x16xf32>, vector<64x16xf32> -> vector<64x16xf32>
    %c0_5 = arith.constant 0 : index
    %c0_6 = arith.constant 0 : index
    %5 = vector.load %arg3[%c0_5, %c0_6] : memref<1x16xf32, #tpu.memory_space<vmem>>, vector<1x16xf32>
    %6 = vector.broadcast %5 : vector<1x16xf32> to vector<64x16xf32>
    %7 = arith.addf %4, %6 : vector<64x16xf32>
    %cst_7 = arith.constant 0.000000e+00 : f32
    %8 = vector.broadcast %cst_7 : f32 to vector<64x16xf32>
    %9 = arith.maximumf %7, %8 : vector<64x16xf32>
    %cst_8 = arith.constant 0.000000e+00 : f32
    %10 = vector.broadcast %cst_8 : f32 to vector<10x10x16xf32>
    %c0_9 = arith.constant 0 : index
    %c0_10 = arith.constant 0 : index
    %c0_11 = arith.constant 0 : index
    %11 = vector.load %arg9[%c0_9, %c0_10, %c0_11] : memref<10x10x16xf32, #tpu.memory_space<vmem>>, vector<10x10x16xf32>
    tpu.vector_store %arg9[%c0_9, %c0_10, %c0_11], %10 {strides = array<i32>} : memref<10x10x16xf32, #tpu.memory_space<vmem>>, vector<10x10x16xf32>,
    %12 = vector.shape_cast %9 : vector<64x16xf32> to vector<8x8x16xf32>
    %c1 = arith.constant 1 : index
    %c1_12 = arith.constant 1 : index
    %c0_13 = arith.constant 0 : index
    %13 = vector.load %arg9[%c1, %c1_12, %c0_13] : memref<10x10x16xf32, #tpu.memory_space<vmem>>, vector<8x8x16xf32>
    tpu.vector_store %arg9[%c1, %c1_12, %c0_13], %12 {strides = array<i32>} : memref<10x10x16xf32, #tpu.memory_space<vmem>>, vector<8x8x16xf32>,
    %cst_14 = arith.constant 0.000000e+00 : f32
    %14 = vector.broadcast %cst_14 : f32 to vector<8x8x16xf32>
    %c0_15 = arith.constant 0 : index
    %c0_16 = arith.constant 0 : index
    %c0_17 = arith.constant 0 : index
    %15 = vector.load %arg9[%c0_15, %c0_16, %c0_17] : memref<10x10x16xf32, #tpu.memory_space<vmem>>, vector<8x8x16xf32>
    %c0_18 = arith.constant 0 : index
    %c0_19 = arith.constant 0 : index
    %16 = vector.load %arg4[%c0_18, %c0_19] : memref<9x16xf32, #tpu.memory_space<vmem>>, vector<1x16xf32>
    %17 = vector.shape_cast %16 : vector<1x16xf32> to vector<1x1x16xf32>
    %18 = vector.broadcast %17 : vector<1x1x16xf32> to vector<8x8x16xf32>
    %19 = arith.mulf %15, %18 : vector<8x8x16xf32>
    %20 = arith.addf %14, %19 : vector<8x8x16xf32>
    %c0_20 = arith.constant 0 : index
    %c1_21 = arith.constant 1 : index
    %c0_22 = arith.constant 0 : index
    %21 = vector.load %arg9[%c0_20, %c1_21, %c0_22] : memref<10x10x16xf32, #tpu.memory_space<vmem>>, vector<8x8x16xf32>
    %c1_23 = arith.constant 1 : index
    %c0_24 = arith.constant 0 : index
    %22 = vector.load %arg4[%c1_23, %c0_24] : memref<9x16xf32, #tpu.memory_space<vmem>>, vector<1x16xf32>
    %23 = vector.shape_cast %22 : vector<1x16xf32> to vector<1x1x16xf32>
    %24 = vector.broadcast %23 : vector<1x1x16xf32> to vector<8x8x16xf32>
    %25 = arith.mulf %21, %24 : vector<8x8x16xf32>
    %26 = arith.addf %20, %25 : vector<8x8x16xf32>
    %c0_25 = arith.constant 0 : index
    %c2 = arith.constant 2 : index
    %c0_26 = arith.constant 0 : index
    %27 = vector.load %arg9[%c0_25, %c2, %c0_26] : memref<10x10x16xf32, #tpu.memory_space<vmem>>, vector<8x8x16xf32>
    %c2_27 = arith.constant 2 : index
    %c0_28 = arith.constant 0 : index
    %28 = vector.load %arg4[%c2_27, %c0_28] : memref<9x16xf32, #tpu.memory_space<vmem>>, vector<1x16xf32>
    %29 = vector.shape_cast %28 : vector<1x16xf32> to vector<1x1x16xf32>
    %30 = vector.broadcast %29 : vector<1x1x16xf32> to vector<8x8x16xf32>
    %31 = arith.mulf %27, %30 : vector<8x8x16xf32>
    %32 = arith.addf %26, %31 : vector<8x8x16xf32>
    %c1_29 = arith.constant 1 : index
    %c0_30 = arith.constant 0 : index
    %c0_31 = arith.constant 0 : index
    %33 = vector.load %arg9[%c1_29, %c0_30, %c0_31] : memref<10x10x16xf32, #tpu.memory_space<vmem>>, vector<8x8x16xf32>
    %c3 = arith.constant 3 : index
    %c0_32 = arith.constant 0 : index
    %34 = vector.load %arg4[%c3, %c0_32] : memref<9x16xf32, #tpu.memory_space<vmem>>, vector<1x16xf32>
    %35 = vector.shape_cast %34 : vector<1x16xf32> to vector<1x1x16xf32>
    %36 = vector.broadcast %35 : vector<1x1x16xf32> to vector<8x8x16xf32>
    %37 = arith.mulf %33, %36 : vector<8x8x16xf32>
    %38 = arith.addf %32, %37 : vector<8x8x16xf32>
    %c1_33 = arith.constant 1 : index
    %c1_34 = arith.constant 1 : index
    %c0_35 = arith.constant 0 : index
    %39 = vector.load %arg9[%c1_33, %c1_34, %c0_35] : memref<10x10x16xf32, #tpu.memory_space<vmem>>, vector<8x8x16xf32>
    %c4 = arith.constant 4 : index
    %c0_36 = arith.constant 0 : index
    %40 = vector.load %arg4[%c4, %c0_36] : memref<9x16xf32, #tpu.memory_space<vmem>>, vector<1x16xf32>
    %41 = vector.shape_cast %40 : vector<1x16xf32> to vector<1x1x16xf32>
    %42 = vector.broadcast %41 : vector<1x1x16xf32> to vector<8x8x16xf32>
    %43 = arith.mulf %39, %42 : vector<8x8x16xf32>
    %44 = arith.addf %38, %43 : vector<8x8x16xf32>
    %c1_37 = arith.constant 1 : index
    %c2_38 = arith.constant 2 : index
    %c0_39 = arith.constant 0 : index
    %45 = vector.load %arg9[%c1_37, %c2_38, %c0_39] : memref<10x10x16xf32, #tpu.memory_space<vmem>>, vector<8x8x16xf32>
    %c5 = arith.constant 5 : index
    %c0_40 = arith.constant 0 : index
    %46 = vector.load %arg4[%c5, %c0_40] : memref<9x16xf32, #tpu.memory_space<vmem>>, vector<1x16xf32>
    %47 = vector.shape_cast %46 : vector<1x16xf32> to vector<1x1x16xf32>
    %48 = vector.broadcast %47 : vector<1x1x16xf32> to vector<8x8x16xf32>
    %49 = arith.mulf %45, %48 : vector<8x8x16xf32>
    %50 = arith.addf %44, %49 : vector<8x8x16xf32>
    %c2_41 = arith.constant 2 : index
    %c0_42 = arith.constant 0 : index
    %c0_43 = arith.constant 0 : index
    %51 = vector.load %arg9[%c2_41, %c0_42, %c0_43] : memref<10x10x16xf32, #tpu.memory_space<vmem>>, vector<8x8x16xf32>
    %c6 = arith.constant 6 : index
    %c0_44 = arith.constant 0 : index
    %52 = vector.load %arg4[%c6, %c0_44] : memref<9x16xf32, #tpu.memory_space<vmem>>, vector<1x16xf32>
    %53 = vector.shape_cast %52 : vector<1x16xf32> to vector<1x1x16xf32>
    %54 = vector.broadcast %53 : vector<1x1x16xf32> to vector<8x8x16xf32>
    %55 = arith.mulf %51, %54 : vector<8x8x16xf32>
    %56 = arith.addf %50, %55 : vector<8x8x16xf32>
    %c2_45 = arith.constant 2 : index
    %c1_46 = arith.constant 1 : index
    %c0_47 = arith.constant 0 : index
    %57 = vector.load %arg9[%c2_45, %c1_46, %c0_47] : memref<10x10x16xf32, #tpu.memory_space<vmem>>, vector<8x8x16xf32>
    %c7 = arith.constant 7 : index
    %c0_48 = arith.constant 0 : index
    %58 = vector.load %arg4[%c7, %c0_48] : memref<9x16xf32, #tpu.memory_space<vmem>>, vector<1x16xf32>
    %59 = vector.shape_cast %58 : vector<1x16xf32> to vector<1x1x16xf32>
    %60 = vector.broadcast %59 : vector<1x1x16xf32> to vector<8x8x16xf32>
    %61 = arith.mulf %57, %60 : vector<8x8x16xf32>
    %62 = arith.addf %56, %61 : vector<8x8x16xf32>
    %c2_49 = arith.constant 2 : index
    %c2_50 = arith.constant 2 : index
    %c0_51 = arith.constant 0 : index
    %63 = vector.load %arg9[%c2_49, %c2_50, %c0_51] : memref<10x10x16xf32, #tpu.memory_space<vmem>>, vector<8x8x16xf32>
    %c8 = arith.constant 8 : index
    %c0_52 = arith.constant 0 : index
    %64 = vector.load %arg4[%c8, %c0_52] : memref<9x16xf32, #tpu.memory_space<vmem>>, vector<1x16xf32>
    %65 = vector.shape_cast %64 : vector<1x16xf32> to vector<1x1x16xf32>
    %66 = vector.broadcast %65 : vector<1x1x16xf32> to vector<8x8x16xf32>
    %67 = arith.mulf %63, %66 : vector<8x8x16xf32>
    %68 = arith.addf %62, %67 : vector<8x8x16xf32>
    %c0_53 = arith.constant 0 : index
    %c0_54 = arith.constant 0 : index
    %69 = vector.load %arg5[%c0_53, %c0_54] : memref<1x16xf32, #tpu.memory_space<vmem>>, vector<1x16xf32>
    %70 = vector.shape_cast %69 : vector<1x16xf32> to vector<1x1x16xf32>
    %71 = vector.broadcast %70 : vector<1x1x16xf32> to vector<8x8x16xf32>
    %72 = arith.addf %68, %71 : vector<8x8x16xf32>
    %cst_55 = arith.constant 0.000000e+00 : f32
    %73 = vector.broadcast %cst_55 : f32 to vector<8x8x16xf32>
    %74 = arith.maximumf %72, %73 : vector<8x8x16xf32>
    %75 = vector.shape_cast %74 : vector<8x8x16xf32> to vector<64x16xf32>
    %c0_56 = arith.constant 0 : index
    %c0_57 = arith.constant 0 : index
    %76 = vector.load %arg6[%c0_56, %c0_57] : memref<16x16xf32, #tpu.memory_space<vmem>>, vector<16x16xf32>
    %cst_58 = arith.constant dense<0.000000e+00> : vector<64x16xf32>
    %77 = tpu.matmul %75, %76, %cst_58 {dimension_numbers = #tpu.dot_dimension_numbers<[1], [0], [0], [1], [0, 0, 1, 1], [], []>} : vector<64x16xf32>, vector<16x16xf32>, vector<64x16xf32> -> vector<64x16xf32>
    %c0_59 = arith.constant 0 : index
    %c0_60 = arith.constant 0 : index
    %78 = vector.load %arg7[%c0_59, %c0_60] : memref<1x16xf32, #tpu.memory_space<vmem>>, vector<1x16xf32>
    %79 = vector.broadcast %78 : vector<1x16xf32> to vector<64x16xf32>
    %80 = arith.addf %77, %79 : vector<64x16xf32>
    %81 = vector.shape_cast %1 : vector<8x8x16xf32> to vector<64x16xf32>
    %82 = arith.addf %80, %81 : vector<64x16xf32>
    %cst_61 = arith.constant 0.000000e+00 : f32
    %83 = vector.broadcast %cst_61 : f32 to vector<64x16xf32>
    %84 = arith.maximumf %82, %83 : vector<64x16xf32>
    %c0_62 = arith.constant 0 : index
    %c0_63 = arith.constant 0 : index
    %c0_64 = arith.constant 0 : index
    %85 = vector.load %arg8[%c0_62, %c0_63, %c0_64] : memref<1x64x16xf32, #tpu.memory_space<vmem>>, vector<1x64x16xf32>
    %86 = vector.shape_cast %85 : vector<1x64x16xf32> to vector<64x16xf32>
    %87 = vector.shape_cast %84 : vector<64x16xf32> to vector<1x64x16xf32>
    tpu.vector_store %arg8[%c0_62, %c0_63, %c0_64], %87 {strides = array<i32>} : memref<1x64x16xf32, #tpu.memory_space<vmem>>, vector<1x64x16xf32>,
    return
  }
  func.func @transform_0(%arg0: i32) -> (i32, i32, i32, i32) {
    %c0_i32 = arith.constant 0 : i32
    %c0_i32_0 = arith.constant 0 : i32
    %c0_i32_1 = arith.constant 0 : i32
    %c0_i32_2 = arith.constant 0 : i32
    return %arg0, %c0_i32, %c0_i32_0, %c0_i32_1 : i32, i32, i32, i32
  }
  func.func @transform_1(%arg0: i32) -> (i32, i32) {
    %c0_i32 = arith.constant 0 : i32
    %c0_i32_0 = arith.constant 0 : i32
    %c0_i32_1 = arith.constant 0 : i32
    return %c0_i32, %c0_i32_0 : i32, i32
  }
  func.func @transform_2(%arg0: i32) -> (i32, i32) {
    %c0_i32 = arith.constant 0 : i32
    %c0_i32_0 = arith.constant 0 : i32
    %c0_i32_1 = arith.constant 0 : i32
    return %c0_i32, %c0_i32_0 : i32, i32
  }
  func.func @transform_3(%arg0: i32) -> (i32, i32) {
    %c0_i32 = arith.constant 0 : i32
    %c0_i32_0 = arith.constant 0 : i32
    %c0_i32_1 = arith.constant 0 : i32
    return %c0_i32, %c0_i32_0 : i32, i32
  }
  func.func @transform_4(%arg0: i32) -> (i32, i32) {
    %c0_i32 = arith.constant 0 : i32
    %c0_i32_0 = arith.constant 0 : i32
    %c0_i32_1 = arith.constant 0 : i32
    return %c0_i32, %c0_i32_0 : i32, i32
  }
  func.func @transform_5(%arg0: i32) -> (i32, i32) {
    %c0_i32 = arith.constant 0 : i32
    %c0_i32_0 = arith.constant 0 : i32
    %c0_i32_1 = arith.constant 0 : i32
    return %c0_i32, %c0_i32_0 : i32, i32
  }
  func.func @transform_6(%arg0: i32) -> (i32, i32) {
    %c0_i32 = arith.constant 0 : i32
    %c0_i32_0 = arith.constant 0 : i32
    %c0_i32_1 = arith.constant 0 : i32
    return %c0_i32, %c0_i32_0 : i32, i32
  }
  func.func @transform_7(%arg0: i32) -> (i32, i32, i32) {
    %c0_i32 = arith.constant 0 : i32
    %c0_i32_0 = arith.constant 0 : i32
    %c0_i32_1 = arith.constant 0 : i32
    return %arg0, %c0_i32, %c0_i32_0 : i32, i32, i32
  }
}

</mosaic_0001>

<bundles_post_ra>
// kernel: tpu_custom_call.1
= control target key start
LH: loop header
LB: loop body
LE: loop exit
PB: predicated region body
PF: predicated region fallthrough
CT: control target
= control target key end

     0   :  { %12 = vsyncpa [#allocation4], 0  ;;  %s1628_s0 = inlined_call_operand.hbm [shape: f32[2,8,8,16], index: 0, kind: input, shape index: {}]   ;;  %s1629_s1 = inlined_call_operand.hbm [shape: f32[16,16], index: 1, kind: input, shape index: {}]   ;;  %s1630_s2 = inlined_call_operand.vmem [shape: f32[1,16], index: 2, kind: input, shape index: {}]   ;;  %s1631_s3 = inlined_call_operand.hbm [shape: f32[9,16], index: 3, kind: input, shape index: {}]   ;;  %s1632_s4 = inlined_call_operand.vmem [shape: f32[1,16], index: 4, kind: input, shape index: {}]   ;;  %s1633_s5 = inlined_call_operand.hbm [shape: f32[16,16], index: 5, kind: input, shape index: {}]   ;;  %s1634_s6 = inlined_call_operand.vmem [shape: f32[1,16], index: 6, kind: input, shape index: {}]   ;;  %s1635_s7 = inlined_call_operand.vmem [shape: f32[2,64,16], index: 7, kind: output, shape index: {}]  }
   0x1   :  { %14 = vsyncpa [#allocation4 + $0x1], 0 }
   0x2   :  { %15 = vsyncpa [#allocation6], 0 }
   0x3   :  { %16 = vsyncpa [#allocation9], 0  ;;  %s1250_s24 = smov 0   ;;  %s1252_s25 = smov 0  }
   0x4   :  { %s1254_s26 = smov 0   ;;  %s1256_s27 = smov 0  }
   0x5 LB: > { %s1269_s28 = sadd.s32 4294967295, %s1202_s27   ;;  %p42_p0 = scmp.ne.s32.totalorder %s1194_s25, %s1190_s24  ;;  %s1202_s27 = sphi %s1256_s27, %s1643_s27   ;;  %s1198_s26 = sphi %s1254_s26, %s1642_s26   ;;  %s1194_s25 = sphi %s1252_s25, %s1641_s25   ;;  %s1190_s24 = sphi %s1250_s24, %s1640_s24  }
   0x6   : > { %p43_p1 = scmp.eq.s32.totalorder %s1269_s28, 0  ;;  %p916_p2 = scmp.ge.s32.totalorder %s1202_s27, 1 }
   0x7   : > { %p205_p3 = scmp.lt.s32.totalorder %s1202_s27, 3  ;;  %s216_s9 = sshll.u32 %s1629_s1, 4  ;;  %s217_s9 = int_to_ptr.hbm [resolvable:$true] %s216_s9 }
   0x8   : > { %p1277_p4 = por %p43_p1, %p42_p0  ;;  %s1204_s11 = smov [#allocation5]  }
   0x9   : > { %p1284_p5 = pnand %p916_p2, %p205_p3  ;;  %s218_s12 = sshll.u32 %s1204_s11, 4  ;;  %s219_s12 = int_to_ptr.vmem [resolvable:$true] %s218_s12 }
   0xa   : > { %s233_s16 = sshll.u32 %s1631_s3, 4  ;;  %s1205_s17 = smov 128   ;;  %s234_s16 = int_to_ptr.hbm [resolvable:$true] %s233_s16 }
   0xb   : > { %p969_p6 = pneg %p1284_p5  ;;  %s1206_s18 = smov 8  }
   0xc   : > { %s1207_s19 = smov [#allocation7]   ;;  %s250_s23 = sshll.u32 %s1633_s5, 4  ;;  %s251_s23 = int_to_ptr.hbm [resolvable:$true] %s250_s23 }
   0xd   : > { %p1292_p7 = pnand %p969_p6, %p43_p1  ;;  %s235_s20 = sshll.u32 %s1207_s19, 4  ;;  %s236_s20 = int_to_ptr.vmem [resolvable:$true] %s235_s20 }
   0xe   : > { %s1208_s24 = smov [#allocation8]   ;;  %s1313_s8 = sadd.s32 1, %s1202_s27  }
   0xf   : > { %972 = dma.hbm_to_vmem [thread:$0]  (!%p1292_p7), %s217_s9, 256, %s219_s12, [#allocation6], %s1205_s17, %s1205_s17, %s1206_s18  }
  0x10   : > { %975 = dma.hbm_to_vmem [thread:$0]  (!%p1292_p7), %s234_s16, 256, %s236_s20, [#allocation6], %s1205_s17, %s1205_s17, %s1206_s18  }
  0x11   : > { %s252_s30 = sshll.u32 %s1208_s24, 4  ;;  %s26_s9 = ssub.s32 %s1202_s27, %s1313_s8  ;;  %s253_s30 = int_to_ptr.vmem [resolvable:$true] %s252_s30 }
  0x12   : > { %978 = dma.hbm_to_vmem [thread:$0]  (!%p1292_p7), %s251_s23, 256, %s253_s30, [#allocation9], %s1205_s17, %s1205_s17, %s1206_s18  }
  0x13   : > { %s29_s11 = sadd.s32 1, %s1198_s26  ;;  %p27_p8 = scmp.eq.s32.totalorder %s26_s9, 0 }
  0x14   : > { %p36_p9 = scmp.ne.s32.totalorder %s1198_s26, %s1194_s25  ;;  %p37_p10 = scmp.eq.s32.totalorder %s1202_s27, 0 }
  0x15   : > { %p986_p11 = scmp.lt.s32.totalorder %s1202_s27, 2  ;;  %s269_s14 = sand.u32 1, %s1198_s26  }
  0x16   : > { %s1328_s12 = scalar_select %p27_p8, %s1198_s26, %s29_s11  }
  0x17   : > { %p38_p12 = por %p37_p10, %p36_p9  ;;  %s921_s15 = sshll.u32 %s269_s14, 6 }
  0x18   : > { %s949_s16 = sshll.u32 %s1202_s27, 6  ;;  %s273_s21 = scalar_lea.vmem [#allocation3], %s921_s15 }
  0x19   : > { %s278_s13 = scalar_lea.hbm %s1628_s0, %s949_s16  ;;  %s281_s22 = sshll.u32 %s273_s21, 4  ;;  %s282_s22 = int_to_ptr.vmem [resolvable:$true] %s281_s22 }
  0x1a   : > { %s279_s24 = sshll.u32 %s278_s13, 4  ;;  %p1335_p13 = pnand %p986_p11, %p38_p12  ;;  %s280_s24 = int_to_ptr.hbm [resolvable:$true] %s279_s24 }
  0x1b   : > { %s270_s30 = scalar_lea.sflag [#allocation4], %s269_s14  ;;  %s1130_s9 = sshra.s32 %s280_s24, 4  ;;  %s1131_s9 = int_to_ptr.hbm [resolvable:$true] %s1130_s9 }
  0x1c   : > { %s1132_s11 = scalar_lea.hbm %s1131_s9, 64  ;;  %p1134_p2 = pneg %p1335_p13 }
  0x1d   : > { %p1133_p0 = scmp.ne.s32.totalorder %s1131_s9, %s1132_s11  ;;  %s1137_s16 = scalar_lea.hbm %s1628_s0, 128 }
  0x1e   : > { %p1138_p7 = scmp.lt.s32.totalorder %s1131_s9, %s1628_s0  ;;  %p1139_p8 = scmp.lt.s32.totalorder %s1137_s16, %s1132_s11 }
  0x1f   : > { %p1135_p3 = pnand %p1134_p2, %p1133_p0 }
  0x20   : > { %p1140_p9 = por %p1139_p8, %p1138_p7 }
  0x21   : > { %p1136_p6 = pneg %p1135_p3 }
  0x23   : > { %p1141_p10 = pnand %p1140_p9, %p1136_p6 }
  0x25   : > { %1144 = shalt.err (!%p1141_p10)
}
  0x26   : > { %982 = dma.hbm_to_vmem [thread:$0]  (!%p1335_p13), %s280_s24, 1024, %s282_s22, %s270_s30, %s1205_s17, %s1205_s17, %s1206_s18  }
  0x27   : > { %293 = sbr.rel (%p1284_p5) target bundleno = 401 (0x191), region = 48  ;;  %s295_s14 = sand.u32 (!%p1284_p5), 1, %s1194_s25  }
  0x28   : > { %s925_s13 = sshll.u32 (!%p1284_p5), %s295_s14, 6  ;;  %s296_s21 = scalar_lea.sflag (!%p1284_p5), [#allocation4], %s295_s14 }
  0x29   : > { %s299_s27 = scalar_lea.vmem (!%p1284_p5), [#allocation3], %s925_s13 }
  0x2c   : > { %1177 = dma.done.wait (%p1277_p4), %s296_s21, 1024  }
  0x2d   : > { %1179 = vsyncadd (%p1277_p4), %s296_s21, 4294966272 }
  0x2e   : > { %1181 = dma.done.wait (%p43_p1), [#allocation6], 512  }
  0x2f   : > { %1183 = vsyncadd (%p43_p1), [#allocation6], 4294966784 }
  0x30   : > { %1185 = dma.done.wait (%p43_p1), [#allocation9], 256  }
  0x31   : > { %1187 = vsyncadd (%p43_p1), [#allocation9], 4294967040  ;;  %v360_v0 = vld [vmem:[#allocation5 + $0x8] sm:$0xff]  ;;  %v359_v1 = vld [vmem:[#allocation5] sm:$0xff]  ;;  %vm365_vm0 = vcmask 130048   ;;  %vm440_vm1 = vcmask 123904  }
  0x32   : > { %404 = vmatpush.msra.mxu0 %v360_v0  ;;  %v1367_v2 = vld [vmem:[%s299_s27] sm:$0xff]  ;;  %951 = vmatpush.msra.mxu2 %v360_v0  ;;  %v1375_v4 = vld [vmem:[%s299_s27 + $0x8] sm:$0xff]  ;;  %v1383_v6 = vld [vmem:[%s299_s27 + $0x10] sm:$0xff]  ;;  %v1209_v10 = vmov 0.0   ;;  %p346_p1 = scmp.lt.s32.totalorder %s1269_s28, 1 }
  0x33   : > { %v1369_v3 = vld [vmem:[%s299_s27 + $0x20] sm:$0xff]  ;;  %v1377_v5 = vld [vmem:[%s299_s27 + $0x28] sm:$0xff]  ;;  %v1385_v7 = vld [vmem:[%s299_s27 + $0x30] sm:$0xff]  ;;  %442 = vst.msk [vmem:[#allocation2 + $0x10] sm:$0xff] %vm365_vm0, %v1209_v10 }
  0x34   : > { %405 = vmatpush.msra.mxu0 %v359_v1  ;;  %952 = vmatpush.msra.mxu2 %v359_v1  ;;  %v1391_v8 = vld [vmem:[%s299_s27 + $0x18] sm:$0xff]  ;;  %443 = vst.msk [vmem:[#allocation2 + $0x18] sm:$0x3] %vm440_vm1, %v1209_v10  ;;  %v1422_v11 = vld [vmem:[%s1630_s2] ss:$0 sm:$0xff]  ;;  %v725_v12 = vld [vmem:[#allocation8 + $0x8] sm:$0xff] }
  0x35   : > { %931 = vmatmul.msk.f32.vlgmr.msra.gmra.mxu0 %vm365_vm0, %v1367_v2  ;;  %935 = vmatmul.msk.f32.vlgmr.msra.gmra.mxu2 %vm365_vm0, %v1369_v3  ;;  %v1393_v9 = vld [vmem:[%s299_s27 + $0x38] sm:$0xff]  ;;  %439 = vst.msk [vmem:[#allocation2] sm:$0xff] %vm365_vm0, %v1209_v10  ;;  %v724_v13 = vld [vmem:[#allocation8] sm:$0xff]  ;;  %v1424_v14 = vld [vmem:[#allocation7] ss:$0 sm:$0xff]  ;;  %s1645_s28 = smov (!%p346_p1, %s1269_s28), 1 }
  0x36   : > { %441 = vst.msk [vmem:[#allocation2 + $0x8] sm:$0x3] %vm440_vm1, %v1209_v10  ;;  %768 = vmatpush.msra.mxu1 %v725_v12  ;;  %953 = vmatpush.msra.mxu3 %v725_v12  ;;  %v1426_v15 = vld [vmem:[#allocation7 + $0x1] ss:$0 sm:$0xff]  ;;  %v1431_v23 = vld [vmem:[#allocation7 + $0x2] ss:$0 sm:$0xff] }
  0x37   : > { %444 = vst.msk [vmem:[#allocation2 + $0x20] sm:$0xff] %vm365_vm0, %v1209_v10  ;;  %v1437_v32 = vld [vmem:[#allocation7 + $0x3] ss:$0 sm:$0xff]  ;;  %v1440_v35 = vld [vmem:[#allocation7 + $0x4] ss:$0 sm:$0xff]  ;;  %s950_s23 = sshll.u32 %s1645_s28, 6 }
  0x38   : > { %445 = vst.msk [vmem:[#allocation2 + $0x28] sm:$0x3] %vm440_vm1, %v1209_v10  ;;  %769 = vmatpush.msra.mxu1 %v724_v13  ;;  %954 = vmatpush.msra.mxu3 %v724_v13  ;;  %v1448_v45 = vld [vmem:[#allocation7 + $0x5] ss:$0 sm:$0xff]  ;;  %v1451_v51 = vld [vmem:[#allocation7 + $0x6] ss:$0 sm:$0xff]  ;;  %s1590_s11 = scalar_lea.vmem %s1635_s7, %s950_s23 }
  0x39   : > { %446 = vst.msk [vmem:[#allocation2 + $0x30] sm:$0xff] %vm365_vm0, %v1209_v10  ;;  %v1453_v53 = vld [vmem:[#allocation7 + $0x7] ss:$0 sm:$0xff]  ;;  %v1458_v59 = vld [vmem:[#allocation7 + $0x8] ss:$0 sm:$0xff] }
  0x3a   : > { %447 = vst.msk [vmem:[#allocation2 + $0x38] sm:$0x3] %vm440_vm1, %v1209_v10 }
  0x3b   : > { %448 = vst.msk [vmem:[#allocation2 + $0x40] sm:$0xff] %vm365_vm0, %v1209_v10 }
  0x3c   : > { %449 = vst.msk [vmem:[#allocation2 + $0x48] sm:$0x3] %vm440_vm1, %v1209_v10  ;;  %v469_v17 = vld [vmem:[#allocation2] sm:$0xff] }
  0x3d   : > { %932 = vmatmul.msk.f32.gmra.mxu0 %vm365_vm0, %v1375_v4  ;;  %936 = vmatmul.msk.f32.gmra.mxu2 %vm365_vm0, %v1377_v5  ;;  %450 = vst.msk [vmem:[#allocation2 + $0x50] sm:$0xff] %vm365_vm0, %v1209_v10  ;;  %v495_v18 = vld [vmem:[#allocation2 + $0x1] sm:$0xff]  ;;  %v479_v21 = vmul.f32 %v1424_v14, %v469_v17 }
  0x3e   : > { %451 = vst.msk [vmem:[#allocation2 + $0x58] sm:$0x3] %vm440_vm1, %v1209_v10  ;;  %v505_v22 = vmul.f32 %v1426_v15, %v495_v18  ;;  %v521_v24 = vld [vmem:[#allocation2 + $0x2] sm:$0xff] }
  0x3f   : > { %452 = vst.msk [vmem:[#allocation2 + $0x60] sm:$0xff] %vm365_vm0, %v1209_v10  ;;  %v531_v28 = vmul.f32 %v1431_v23, %v521_v24 }
  0x40   : > { %453 = vst.msk [vmem:[#allocation2 + $0x68] sm:$0x3] %vm440_vm1, %v1209_v10  ;;  %v513_v27 = vadd.f32 %v505_v22, %v479_v21 }
  0x41   : > { %454 = vst.msk [vmem:[#allocation2 + $0x70] sm:$0xff] %vm365_vm0, %v1209_v10 }
  0x42   : > { %455 = vst.msk [vmem:[#allocation2 + $0x78] sm:$0x3] %vm440_vm1, %v1209_v10  ;;  %v539_v34 = vadd.f32 %v531_v28, %v513_v27 }
  0x43   : > { %456 = vst.msk [vmem:[#allocation2 + $0x80] sm:$0xff] %vm365_vm0, %v1209_v10 }
  0x44   : > { %457 = vst.msk [vmem:[#allocation2 + $0x88] sm:$0x3] %vm440_vm1, %v1209_v10 }
  0x45   : > { %933 = vmatmul.msk.f32.gmra.mxu0 %vm365_vm0, %v1383_v6  ;;  %937 = vmatmul.msk.f32.gmra.mxu2 %vm365_vm0, %v1385_v7  ;;  %458 = vst.msk [vmem:[#allocation2 + $0x90] sm:$0xff] %vm365_vm0, %v1209_v10 }
  0x46   : > { %459 = vst.msk [vmem:[#allocation2 + $0x98] sm:$0x3] %vm440_vm1, %v1209_v10 }
  0x4d   : > { %934 = vmatmul.msk.f32.gmra.mxu0 %vm365_vm0, %v1391_v8  ;;  %938 = vmatmul.msk.f32.gmra.mxu2 %vm365_vm0, %v1393_v9 }
  0xb2   : > { %v407_v16 = vpop.f32.mrf.mxu0 }
  0xb3   : > { %v408_v19 = vadd.f32 %v1422_v11, %v407_v16 }
  0xb5   : > { %v431_v20 = vmax.f32 %v408_v19, 0.0 }
  0xb7   : > { %461 = vst.msk [vmem:[#allocation2 + $0x11] sm:$0xff] %vm365_vm0, %v431_v20 }
  0xb8   : > { %v419_v25 = vpop.f32.mrf.mxu2 }
  0xb9   : > { %v420_v26 = vadd.f32 %v1422_v11, %v419_v25 }
  0xba   : > { %v410_v29 = vpop.f32.mrf.mxu0 }
  0xbb   : > { %v411_v30 = vadd.f32 %v1422_v11, %v410_v29  ;;  %v435_v31 = vmax.f32 %v420_v26, 0.0  ;;  %v1481_v29 = vld [vmem:[%s1632_s4] ss:$0 sm:$0xff] }
  0xbd   : > { %v432_v33 = vmax.f32 %v411_v30, 0.0  ;;  %465 = vst.msk [vmem:[#allocation2 + $0x51] sm:$0xff] %vm365_vm0, %v435_v31 }
  0xbe   : > { %v547_v36 = vld [vmem:[#allocation2 + $0x10] sm:$0xff] }
  0xbf   : > { %v573_v37 = vld [vmem:[#allocation2 + $0x11] sm:$0xff]  ;;  %462 = vst.msk [vmem:[#allocation2 + $0x21] sm:$0xff] %vm365_vm0, %v432_v33  ;;  %v557_v38 = vmul.f32 %v1437_v32, %v547_v36  ;;  %v480_v39 = vmul.f32 %v1424_v14, %v547_v36 }
  0xc0   : > { %v422_v40 = vpop.f32.mrf.mxu2  ;;  %v506_v41 = vmul.f32 %v1426_v15, %v573_v37  ;;  %v583_v44 = vmul.f32 %v1440_v35, %v573_v37  ;;  %v599_v47 = vld [vmem:[#allocation2 + $0x12] sm:$0xff] }
  0xc1   : > { %v423_v42 = vadd.f32 %v1422_v11, %v422_v40  ;;  %v565_v43 = vadd.f32 %v557_v38, %v539_v34  ;;  %v609_v55 = vmul.f32 %v1448_v45, %v599_v47  ;;  %v532_v56 = vmul.f32 %v1431_v23, %v599_v47 }
  0xc2   : > { %v413_v46 = vpop.f32.mrf.mxu0  ;;  %v514_v52 = vadd.f32 %v506_v41, %v480_v39 }
  0xc3   : > { %v414_v48 = vadd.f32 %v1422_v11, %v413_v46  ;;  %v436_v49 = vmax.f32 %v423_v42, 0.0  ;;  %v591_v50 = vadd.f32 %v583_v44, %v565_v43 }
  0xc4   : > { %v540_v63 = vadd.f32 %v532_v56, %v514_v52  ;;  %v1463_v1 = vld [vmem:[#allocation2 + $0x50] sm:$0xff] }
  0xc5   : > { %v433_v54 = vmax.f32 %v414_v48, 0.0  ;;  %466 = vst.msk [vmem:[#allocation2 + $0x61] sm:$0xff] %vm365_vm0, %v436_v49  ;;  %v617_v60 = vadd.f32 %v609_v55, %v591_v50  ;;  %v1465_v10 = vld [vmem:[#allocation2 + $0x51] sm:$0xff]  ;;  %v484_v25 = vmul.f32 %v1424_v14, %v1463_v1 }
  0xc6   : > { %v626_v57 = vld [vmem:[#allocation2 + $0x20] sm:$0xff]  ;;  %v510_v26 = vmul.f32 %v1426_v15, %v1465_v10  ;;  %v1483_v33 = vld [vmem:[#allocation2 + $0x52] sm:$0xff] }
  0xc7   : > { %v652_v58 = vld [vmem:[#allocation2 + $0x21] sm:$0xff]  ;;  %463 = vst.msk [vmem:[#allocation2 + $0x31] sm:$0xff] %vm365_vm0, %v433_v54  ;;  %v636_v61 = vmul.f32 %v1451_v51, %v626_v57  ;;  %v558_v0 = vmul.f32 %v1437_v32, %v626_v57  ;;  %v481_v16 = vmul.f32 %v1424_v14, %v626_v57  ;;  %v536_v43 = vmul.f32 %v1431_v23, %v1483_v33 }
  0xc8   : > { %v678_v62 = vld [vmem:[#allocation2 + $0x22] sm:$0xff]  ;;  %v662_v12 = vmul.f32 %v1453_v53, %v652_v58  ;;  %v425_v13 = vpop.f32.mrf.mxu2  ;;  %v507_v17 = vmul.f32 %v1426_v15, %v652_v58  ;;  %v584_v21 = vmul.f32 %v1440_v35, %v652_v58  ;;  %v518_v42 = vadd.f32 %v510_v26, %v484_v25 }
  0xc9   : > { %v644_v18 = vadd.f32 %v636_v61, %v617_v60  ;;  %v426_v19 = vadd.f32 %v1422_v11, %v425_v13  ;;  %v566_v20 = vadd.f32 %v558_v0, %v540_v63  ;;  %v688_v24 = vmul.f32 %v1458_v59, %v678_v62 }
  0xca   : > { %v416_v22 = vpop.f32.mrf.mxu0  ;;  %v515_v34 = vadd.f32 %v507_v17, %v481_v16  ;;  %v610_v38 = vmul.f32 %v1448_v45, %v678_v62  ;;  %v533_v41 = vmul.f32 %v1431_v23, %v678_v62  ;;  %v544_v0 = vadd.f32 %v536_v43, %v518_v42 }
  0xcb   : > { %v417_v27 = vadd.f32 %v1422_v11, %v416_v22  ;;  %v670_v28 = vadd.f32 %v662_v12, %v644_v18  ;;  %v437_v30 = vmax.f32 %v426_v19, 0.0  ;;  %v592_v31 = vadd.f32 %v584_v21, %v566_v20 }
  0xcc   : > { %v1493_v48 = vld [vmem:[#allocation2 + $0x60] sm:$0xff]  ;;  %v541_v54 = vadd.f32 %v533_v41, %v515_v34  ;;  %v639_v26 = vmul.f32 %v1451_v51, %v1463_v1 }
  0xcd   : > { %v434_v36 = vmax.f32 %v417_v27, 0.0  ;;  %v696_v37 = vadd.f32 %v688_v24, %v670_v28  ;;  %467 = vst.msk [vmem:[#allocation2 + $0x71] sm:$0xff] %vm365_vm0, %v437_v30  ;;  %v618_v46 = vadd.f32 %v610_v38, %v592_v31  ;;  %v562_v12 = vmul.f32 %v1437_v32, %v1493_v48  ;;  %v1505_v18 = vld [vmem:[#allocation2 + $0x61] sm:$0xff] }
  0xce   : > { %v627_v39 = vld [vmem:[#allocation2 + $0x30] sm:$0xff]  ;;  %v485_v21 = vmul.f32 %v1424_v14, %v1493_v48  ;;  %v511_v22 = vmul.f32 %v1426_v15, %v1505_v18  ;;  %v665_v31 = vmul.f32 %v1453_v53, %v1465_v10 }
  0xcf   : > { %v653_v40 = vld [vmem:[#allocation2 + $0x31] sm:$0xff]  ;;  %464 = vst.msk [vmem:[#allocation2 + $0x41] sm:$0xff] %vm365_vm0, %v434_v36  ;;  %v708_v44 = vadd.f32 %v1481_v29, %v696_v37  ;;  %v637_v47 = vmul.f32 %v1451_v51, %v627_v39  ;;  %v559_v55 = vmul.f32 %v1437_v32, %v627_v39  ;;  %v482_v56 = vmul.f32 %v1424_v14, %v627_v39 }
  0xd0   : > { %v663_v49 = vmul.f32 %v1453_v53, %v653_v40  ;;  %v679_v50 = vld [vmem:[#allocation2 + $0x32] sm:$0xff]  ;;  %v428_v52 = vpop.f32.mrf.mxu2  ;;  %v508_v61 = vmul.f32 %v1426_v15, %v653_v40  ;;  %v585_v63 = vmul.f32 %v1440_v35, %v653_v40  ;;  %v570_v34 = vadd.f32 %v562_v12, %v544_v0 }
  0xd1   : > { %v716_v57 = vmax.f32 %v708_v44, 0.0  ;;  %v645_v58 = vadd.f32 %v637_v47, %v618_v46  ;;  %v429_v60 = vadd.f32 %v1422_v11, %v428_v52  ;;  %v567_v62 = vadd.f32 %v559_v55, %v541_v54  ;;  %v1507_v11 = vld [vmem:[#allocation2 + $0x62] sm:$0xff] }
  0xd2   : > { %v689_v16 = vmul.f32 %v1458_v59, %v679_v50  ;;  %v516_v20 = vadd.f32 %v508_v61, %v482_v56  ;;  %v611_v25 = vmul.f32 %v1448_v45, %v679_v50  ;;  %v534_v30 = vmul.f32 %v1431_v23, %v679_v50 }
  0xd3   : > { %939 = vmatmul.msk.f32.vlgmr.msra.gmra.mxu1 %vm365_vm0, %v716_v57  ;;  %v671_v13 = vadd.f32 %v663_v49, %v645_v58  ;;  %v438_v17 = vmax.f32 %v429_v60, 0.0  ;;  %v593_v19 = vadd.f32 %v585_v63, %v567_v62  ;;  %v588_v36 = vmul.f32 %v1440_v35, %v1505_v18 }
  0xd4   : > { %v614_v40 = vmul.f32 %v1448_v45, %v1507_v11  ;;  %v542_v42 = vadd.f32 %v534_v30, %v516_v20  ;;  %v519_v46 = vadd.f32 %v511_v22, %v485_v21  ;;  %v537_v57 = vmul.f32 %v1431_v23, %v1507_v11  ;;  %v631_v63 = vld [vmem:[#allocation2 + $0x70] sm:$0xff] }
  0xd5   : > { %v697_v24 = vadd.f32 %v689_v16, %v671_v13  ;;  %468 = vst.msk [vmem:[#allocation2 + $0x81] sm:$0xff] %vm365_vm0, %v438_v17  ;;  %v619_v38 = vadd.f32 %v611_v25, %v593_v19  ;;  %v596_v56 = vadd.f32 %v588_v36, %v570_v34  ;;  %v563_v16 = vmul.f32 %v1437_v32, %v631_v63 }
  0xd6   : > { %v628_v27 = vld [vmem:[#allocation2 + $0x40] sm:$0xff]  ;;  %v545_v13 = vadd.f32 %v537_v57, %v519_v46  ;;  %v561_v20 = vmul.f32 %v1437_v32, %v1463_v1  ;;  %v486_v21 = vmul.f32 %v1424_v14, %v631_v63  ;;  %v613_v25 = vmul.f32 %v1448_v45, %v1483_v33 }
  0xd7   : > { %v654_v28 = vld [vmem:[#allocation2 + $0x41] sm:$0xff]  ;;  %v709_v37 = vadd.f32 %v1481_v29, %v697_v24  ;;  %v638_v39 = vmul.f32 %v1451_v51, %v628_v27  ;;  %v560_v43 = vmul.f32 %v1437_v32, %v628_v27  ;;  %v483_v44 = vmul.f32 %v1424_v14, %v628_v27 }
  0xd8   : > { %v680_v41 = vld [vmem:[#allocation2 + $0x42] sm:$0xff]  ;;  %v664_v50 = vmul.f32 %v1453_v53, %v654_v28  ;;  %v509_v52 = vmul.f32 %v1426_v15, %v654_v28  ;;  %v586_v55 = vmul.f32 %v1440_v35, %v654_v28  ;;  %v587_v24 = vmul.f32 %v1440_v35, %v1465_v10  ;;  %v657_v28 = vld [vmem:[#allocation2 + $0x71] sm:$0xff] }
  0xd9   : > { %v717_v47 = vmax.f32 %v709_v37, 0.0  ;;  %v646_v49 = vadd.f32 %v638_v39, %v619_v38  ;;  %v568_v54 = vadd.f32 %v560_v43, %v542_v42  ;;  %v690_v60 = vmul.f32 %v1458_v59, %v680_v41  ;;  %v683_v38 = vld [vmem:[#allocation2 + $0x72] sm:$0xff] }
  0xda   : > { %v517_v61 = vadd.f32 %v509_v52, %v483_v44  ;;  %v535_v62 = vmul.f32 %v1431_v23, %v680_v41  ;;  %v612_v12 = vmul.f32 %v1448_v45, %v680_v41  ;;  %v640_v27 = vmul.f32 %v1451_v51, %v1493_v48 }
  0xdb   : > { %940 = vmatmul.msk.f32.gmra.mxu1 %vm365_vm0, %v717_v47  ;;  %v672_v58 = vadd.f32 %v664_v50, %v646_v49  ;;  %v594_v0 = vadd.f32 %v586_v55, %v568_v54  ;;  %v641_v36 = vmul.f32 %v1451_v51, %v631_v63  ;;  %v512_v1 = vmul.f32 %v1426_v15, %v657_v28 }
  0xdc   : > { %v543_v19 = vadd.f32 %v535_v62, %v517_v61  ;;  %v622_v14 = vadd.f32 %v614_v40, %v596_v56  ;;  %v571_v39 = vadd.f32 %v563_v16, %v545_v13  ;;  %v589_v10 = vmul.f32 %v1440_v35, %v657_v28  ;;  %v632_v52 = vld [vmem:[#allocation2 + $0x80] sm:$0xff] }
  0xdd   : > { %v698_v17 = vadd.f32 %v690_v60, %v672_v58  ;;  %v620_v22 = vadd.f32 %v612_v12, %v594_v0  ;;  %v520_v43 = vadd.f32 %v512_v1, %v486_v21  ;;  %v538_v44 = vmul.f32 %v1431_v23, %v683_v38  ;;  %v658_v58 = vld [vmem:[#allocation2 + $0x81] sm:$0xff] }
  0xde   : > { %v569_v34 = vadd.f32 %v561_v20, %v543_v19  ;;  %v691_v46 = vmul.f32 %v1458_v59, %v1483_v33  ;;  %v666_v15 = vmul.f32 %v1453_v53, %v1505_v18  ;;  %v649_v40 = vadd.f32 %v641_v36, %v622_v14 }
  0xdf   : > { %v710_v30 = vadd.f32 %v1481_v29, %v698_v17  ;;  %v647_v37 = vadd.f32 %v639_v26, %v620_v22  ;;  %v667_v49 = vmul.f32 %v1453_v53, %v657_v28  ;;  %v615_v50 = vmul.f32 %v1448_v45, %v683_v38 }
  0xe0   : > { %v595_v42 = vadd.f32 %v587_v24, %v569_v34  ;;  %v597_v55 = vadd.f32 %v589_v10, %v571_v39  ;;  %v546_v23 = vadd.f32 %v538_v44, %v520_v43  ;;  %v692_v57 = vmul.f32 %v1458_v59, %v1507_v11  ;;  %v684_v11 = vld [vmem:[#allocation2 + $0x82] sm:$0xff]  ;;  %v633_v24 = vld [vmem:[#allocation2 + $0x90] sm:$0xff] }
  0xe1   : > { %v718_v41 = vmax.f32 %v710_v30, 0.0  ;;  %v673_v48 = vadd.f32 %v665_v31, %v647_v37  ;;  %v564_v31 = vmul.f32 %v1437_v32, %v632_v52  ;;  %v675_v18 = vadd.f32 %v667_v49, %v649_v40  ;;  %v659_v34 = vld [vmem:[#allocation2 + $0x91] sm:$0xff] }
  0xe2   : > { %v621_v47 = vadd.f32 %v613_v25, %v595_v42  ;;  %v693_v60 = vmul.f32 %v1458_v59, %v683_v38  ;;  %v642_v61 = vmul.f32 %v1451_v51, %v632_v52  ;;  %v590_v62 = vmul.f32 %v1440_v35, %v658_v58 }
  0xe3   : > { %941 = vmatmul.msk.f32.gmra.mxu1 %vm365_vm0, %v718_v41  ;;  %v699_v26 = vadd.f32 %v691_v46, %v673_v48  ;;  %v623_v12 = vadd.f32 %v615_v50, %v597_v55  ;;  %v572_v13 = vadd.f32 %v564_v31, %v546_v23  ;;  %v668_v17 = vmul.f32 %v1453_v53, %v658_v58 }
  0xe4   : > { %v648_v54 = vadd.f32 %v640_v27, %v621_v47  ;;  %v701_v16 = vadd.f32 %v693_v60, %v675_v18  ;;  %v616_v22 = vmul.f32 %v1448_v45, %v684_v11  ;;  %v694_v35 = vmul.f32 %v1458_v59, %v684_v11  ;;  %v685_v45 = vld [vmem:[#allocation2 + $0x92] sm:$0xff] }
  0xe5   : > { %v711_v33 = vadd.f32 %v1481_v29, %v699_v26  ;;  %v650_v20 = vadd.f32 %v642_v61, %v623_v12  ;;  %v598_v21 = vadd.f32 %v590_v62, %v572_v13  ;;  %v643_v30 = vmul.f32 %v1451_v51, %v633_v24 }
  0xe6   : > { %v674_v56 = vadd.f32 %v666_v15, %v648_v54  ;;  %v713_v25 = vadd.f32 %v1481_v29, %v701_v16  ;;  %v669_v14 = vmul.f32 %v1453_v53, %v659_v34  ;;  %v695_v10 = vmul.f32 %v1458_v59, %v685_v45  ;;  %v1039_v53 = vld [vmem:[%s1634_s6] ss:$0 sm:$0xff] }
  0xe7   : > { %v719_v63 = vmax.f32 %v711_v33, 0.0  ;;  %v676_v27 = vadd.f32 %v668_v17, %v650_v20  ;;  %v624_v28 = vadd.f32 %v616_v22, %v598_v21 }
  0xe8   : > { %v700_v0 = vadd.f32 %v692_v57, %v674_v56  ;;  %v721_v36 = vmax.f32 %v713_v25, 0.0 }
  0xe9   : > { %v702_v1 = vadd.f32 %v694_v35, %v676_v27  ;;  %v651_v37 = vadd.f32 %v643_v30, %v624_v28 }
  0xea   : > { %v712_v32 = vadd.f32 %v1481_v29, %v700_v0 }
  0xeb   : > { %942 = vmatmul.msk.f32.gmra.mxu1 %vm365_vm0, %v719_v63  ;;  %v714_v38 = vadd.f32 %v1481_v29, %v702_v1  ;;  %v677_v39 = vadd.f32 %v669_v14, %v651_v37 }
  0xec   : > { %v720_v19 = vmax.f32 %v712_v32, 0.0 }
  0xed   : > { %v722_v41 = vmax.f32 %v714_v38, 0.0  ;;  %v703_v42 = vadd.f32 %v695_v10, %v677_v39 }
  0xee   : > { %943 = vmatmul.msk.f32.vlgmr.msra.gmra.mxu3 %vm365_vm0, %v720_v19 }
  0xef   : > { %v715_v51 = vadd.f32 %v1481_v29, %v703_v42 }
  0xf1   : > { %v723_v43 = vmax.f32 %v715_v51, 0.0 }
  0xf6   : > { %944 = vmatmul.msk.f32.gmra.mxu3 %vm365_vm0, %v721_v36 }
  0xfe   : > { %945 = vmatmul.msk.f32.gmra.mxu3 %vm365_vm0, %v722_v41 }
 0x106   : > { %946 = vmatmul.msk.f32.gmra.mxu3 %vm365_vm0, %v723_v43 }
 0x150   : > { %v771_v44 = vpop.f32.mrf.mxu1 }
 0x151   : > { %v772_v48 = vadd.f32 %v1039_v53, %v771_v44 }
 0x153   : > { %v795_v59 = vadd.f32 %v772_v48, %v1367_v2 }
 0x155   : > { %v803_v29 = vmax.f32 %v795_v59, 0.0 }
 0x157   : > { %811 = vst.msk [vmem:[%s1590_s11] sm:$0xff] %vm365_vm0, %v803_v29 }
 0x158   : > { %v774_v46 = vpop.f32.mrf.mxu1 }
 0x159   : > { %v775_v47 = vadd.f32 %v1039_v53, %v774_v46 }
 0x15b   : > { %v796_v15 = vadd.f32 %v775_v47, %v1375_v4 }
 0x15d   : > { %v804_v26 = vmax.f32 %v796_v15, 0.0 }
 0x15f   : > { %812 = vst.msk [vmem:[%s1590_s11 + $0x8] sm:$0xff] %vm365_vm0, %v804_v26 }
 0x160   : > { %v777_v2 = vpop.f32.mrf.mxu1 }
 0x161   : > { %v778_v40 = vadd.f32 %v1039_v53, %v777_v2 }
 0x163   : > { %v797_v49 = vadd.f32 %v778_v40, %v1383_v6 }
 0x165   : > { %v805_v50 = vmax.f32 %v797_v49, 0.0 }
 0x167   : > { %813 = vst.msk [vmem:[%s1590_s11 + $0x10] sm:$0xff] %vm365_vm0, %v805_v50 }
 0x168   : > { %v780_v52 = vpop.f32.mrf.mxu1 }
 0x169   : > { %v781_v54 = vadd.f32 %v1039_v53, %v780_v52 }
 0x16b   : > { %v798_v55 = vadd.f32 %v781_v54, %v1391_v8 }
 0x16d   : > { %v806_v23 = vmax.f32 %v798_v55, 0.0 }
 0x16f   : > { %814 = vst.msk [vmem:[%s1590_s11 + $0x18] sm:$0xff] %vm365_vm0, %v806_v23 }
 0x171   : > { %v783_v4 = vpop.f32.mrf.mxu3 }
 0x172   : > { %v784_v31 = vadd.f32 %v1039_v53, %v783_v4 }
 0x174   : > { %v799_v33 = vadd.f32 %v784_v31, %v1369_v3 }
 0x176   : > { %v807_v56 = vmax.f32 %v799_v33, 0.0 }
 0x178   : > { %815 = vst.msk [vmem:[%s1590_s11 + $0x20] sm:$0xff] %vm365_vm0, %v807_v56 }
 0x179   : > { %v786_v6 = vpop.f32.mrf.mxu3 }
 0x17a   : > { %v787_v57 = vadd.f32 %v1039_v53, %v786_v6 }
 0x17c   : > { %v800_v58 = vadd.f32 %v787_v57, %v1377_v5 }
 0x17e   : > { %v808_v18 = vmax.f32 %v800_v58, 0.0 }
 0x180   : > { %816 = vst.msk [vmem:[%s1590_s11 + $0x28] sm:$0xff] %vm365_vm0, %v808_v18 }
 0x181   : > { %v789_v8 = vpop.f32.mrf.mxu3 }
 0x182   : > { %v790_v60 = vadd.f32 %v1039_v53, %v789_v8 }
 0x184   : > { %v801_v61 = vadd.f32 %v790_v60, %v1385_v7 }
 0x186   : > { %v809_v62 = vmax.f32 %v801_v61, 0.0 }
 0x188   : > { %817 = vst.msk [vmem:[%s1590_s11 + $0x30] sm:$0xff] %vm365_vm0, %v809_v62 }
 0x189   : > { %v792_v63 = vpop.f32.mrf.mxu3 }
 0x18a   : > { %v793_v3 = vadd.f32 %v1039_v53, %v792_v63 }
 0x18c   : > { %v802_v0 = vadd.f32 %v793_v3, %v1393_v9 }
 0x18e   : > { %v810_v12 = vmax.f32 %v802_v0, 0.0 }
 0x190   : > { %818 = vst.msk [vmem:[%s1590_s11 + $0x38] sm:$0xff] %vm365_vm0, %v810_v12 }
 0x191 PF: > { %p19_p4 = scmp.ge.s32.totalorder %s1313_s8, 4   ;;  %s1640_s24 = smov %s1194_s25 }
 0x192   : > { %s1641_s25 = smov %s1198_s26  ;;  %s1642_s26 = smov %s1328_s12 }
 0x193   : > { %s1643_s27 = smov %s1313_s8  ;;  %21 = sbr.rel (!%p19_p4) target bundleno = 5 (0x5), region = 102 }
 0x198   :  { %840 = vsyncpa [#allocation4], 1 }
 0x199   :  { %842 = vsyncpa [#allocation4 + $0x1], 1 }
 0x19a   :  { %843 = vsyncpa [#allocation6], 1 }
 0x19b   :  { %844 = vsyncpa [#allocation9], 1 }

</bundles_post_ra>
